<compile_context>
chip_gen: v5e
topology: v5e:2x2
jax: 0.10.0
libtpu: 0.0.40
codegen_flags: <defaults>
</compile_context>

<pallas_src>
import jax
import jax.numpy as jnp
from jax.experimental import pallas as pl
from jax.experimental.pallas import tpu as pltpu


# ----------------------------------------------------------------------------
# Kernels: whole-tile element-wise max(x, 0) on the VPU (memory-bound).
# ----------------------------------------------------------------------------
def _relu1_kernel(x_ref, o_ref):
    o_ref[...] = jnp.maximum(x_ref[...], 0)


def _relu2_kernel(x1_ref, x2_ref, o1_ref, o2_ref):
    o1_ref[...] = jnp.maximum(x1_ref[...], 0)
    o2_ref[...] = jnp.maximum(x2_ref[...], 0)


# ----------------------------------------------------------------------------
# Tiling helpers.
# ----------------------------------------------------------------------------
def _chip_params(itemsize):
    """Returns (sublane_rows, per-array block bytes, min grid steps)."""
    # dtype-aware sublane packing: 8 rows (f32), 16 (bf16), 32 (int8/fp8).
    sub = max(8, 32 // max(1, itemsize))
    block_bytes = 1 << 20  # safe default: fused 4 arrays x 2 bufs = 8 MiB < v5e 16 MiB scoped
    min_steps = 1
    try:
        info = pltpu.get_tpu_info()
        vmem = getattr(info, "vmem_capacity_bytes", None)
        if vmem is not None and vmem <= (64 << 20):
            # v7x-class (64 MiB VMEM/TC, ~3.2 TB/s HBM, 2 TensorCores/chip):
            # bigger blocks (fused residency 16 MiB < 32 MiB scoped default)
            # and at least 2 grid steps so both TCs get work.
            block_bytes = 2 << 20
            min_steps = 2
    except Exception:
        pass
    return sub, block_bytes, min_steps


def _split_bulk(n):
    """Pick (bulk, cols): bulk (multiple of cols) goes through the kernel."""
    if n % 128 == 0:
        for c in (8192, 4096, 2048, 1024, 512, 256, 128):
            if n % c == 0:
                return n, c  # entire array, widest dividing lane dim
    # Unaligned size: wide bulk + a tiny (<1024-element) tail handled outside.
    cols = 1024
    return (n // cols) * cols, cols


def _row_tile(rows, cols, itemsize, block_bytes, min_steps, sub):
    """Row tile: multiple of `sub` (or full extent), sized to ~block_bytes."""
    if rows <= sub:
        return rows  # full-extent block (always legal)
    by_bytes = max(sub, (block_bytes // (cols * itemsize)) // sub * sub)
    rt = min(rows, by_bytes)
    if min_steps > 1 and rows >= min_steps * sub:
        # Guarantee >= min_steps grid steps (keep both v7x TCs busy).
        rt = min(rt, max(sub, (rows // min_steps) // sub * sub))
    return rt


def _relu_core_2d(arrs2d, rt):
    """One pallas_call applying ReLU to 1 or 2 identically-shaped 2-D arrays."""
    rows, cols = arrs2d[0].shape
    dtype = arrs2d[0].dtype
    grid = (pl.cdiv(rows, rt),)
    spec = pl.BlockSpec((rt, cols), lambda i: (i, 0))
    cparams = pltpu.CompilerParams(dimension_semantics=("parallel",))

    if len(arrs2d) == 1:
        out = pl.pallas_call(
            _relu1_kernel,
            out_shape=jax.ShapeDtypeStruct((rows, cols), dtype),
            grid_spec=pltpu.PrefetchScalarGridSpec(
                num_scalar_prefetch=0,
                grid=grid,
                in_specs=[spec],
                out_specs=spec,
            ),
            compiler_params=cparams,
        )(arrs2d[0])
        return [out]

    out1, out2 = pl.pallas_call(
        _relu2_kernel,
        out_shape=(
            jax.ShapeDtypeStruct((rows, cols), dtype),
            jax.ShapeDtypeStruct((rows, cols), dtype),
        ),
        grid_spec=pltpu.PrefetchScalarGridSpec(
            num_scalar_prefetch=0,
            grid=grid,
            in_specs=[spec, spec],
            out_specs=[spec, spec],
        ),
        compiler_params=cparams,
    )(arrs2d[0], arrs2d[1])
    return [out1, out2]


def _relu_flat_group(flats, n, dtype, orig_shapes):
    """ReLU of 1 or 2 same-length, same-dtype flat arrays via one pallas_call."""
    itemsize = jnp.dtype(dtype).itemsize
    bulk, cols = _split_bulk(n)
    if bulk == 0:
        # Tiny array (< 128 elements): not worth a kernel launch.
        return [jnp.maximum(f, 0).reshape(s) for f, s in zip(flats, orig_shapes)]

    rows = bulk // cols
    sub, block_bytes, min_steps = _chip_params(itemsize)
    rt = _row_tile(rows, cols, itemsize, block_bytes, min_steps, sub)

    if bulk == n:
        # Common case: zero-copy reshape, single kernel pass, no extra HBM traffic.
        arrs2d = [f.reshape(rows, cols) for f in flats]
        outs = _relu_core_2d(arrs2d, rt)
        return [o.reshape(s) for o, s in zip(outs, orig_shapes)]

    # Rare unaligned case: aligned bulk through the kernel, tiny tail on XLA.
    arrs2d = [f[:bulk].reshape(rows, cols) for f in flats]
    outs = _relu_core_2d(arrs2d, rt)
    results = []
    for f, o, s in zip(flats, outs, orig_shapes):
        tail = jnp.maximum(f[bulk:], 0)
        results.append(jnp.concatenate([o.reshape(-1), tail]).reshape(s))
    return results


def _pallas_relu(x):
    n = x.size
    if n == 0:
        return x
    return _relu_flat_group([x.reshape(-1)], n, x.dtype, [x.shape])[0]


def relu2d(x):
    """Pallas implementation of ReLU2d.forward: (x1, x2) -> (relu(x1), relu(x2))."""
    x1, x2 = x
    if x1.size > 0 and x1.size == x2.size and x1.dtype == x2.dtype:
        # Fused: one launch, shared grid, two in/out specs.
        o1, o2 = _relu_flat_group(
            [x1.reshape(-1), x2.reshape(-1)], x1.size, x1.dtype,
            [x1.shape, x2.shape],
        )
        return (o1, o2)
    # Shapes/dtypes differ: fall back to two independent launches.
    return (_pallas_relu(x1), _pallas_relu(x2))


def _reference(x):
    x1, x2 = x
    return (jnp.maximum(x1, 0), jnp.maximum(x2, 0))


if __name__ == "__main__":
    key = jax.random.PRNGKey(0)
    B, C, H, W = 2, 4, 16, 16
    k1, k2 = jax.random.split(key, 2)
    x1 = jax.random.normal(k1, (B, C, H, W), dtype=jnp.float32)
    x2 = jax.random.normal(k2, (B, C, H, W), dtype=jnp.float32)

    out1, out2 = relu2d((x1, x2))
    out1 = jax.block_until_ready(out1)
    out2 = jax.block_until_ready(out2)

    ref1, ref2 = _reference((x1, x2))
    assert out1.shape == x1.shape and out2.shape == x2.shape
    assert jnp.allclose(out1, ref1)
    assert jnp.allclose(out2, ref2)

    print("KERNEL_OK")
</pallas_src>

<mosaic_0001>
module attributes {stable_mosaic.version = 11 : i64} {
  func.func @_relu2_kernel(%arg0: i32, %arg1: memref<1x2048xf32, #tpu.memory_space<vmem>>, %arg2: memref<1x2048xf32, #tpu.memory_space<vmem>>, %arg3: memref<1x2048xf32, #tpu.memory_space<vmem>>, %arg4: memref<1x2048xf32, #tpu.memory_space<vmem>>) attributes {dimension_semantics = [#tpu.dimension_semantics<parallel>], iteration_bounds = array<i64: 1>, scalar_prefetch = 0 : i64, scratch_operands = 0 : i64, tpu.core_type = #tpu.core_type<tc>, window_params = [{transform_indices = @transform_0, window_bounds = array<i64: 1, 2048>}, {transform_indices = @transform_1, window_bounds = array<i64: 1, 2048>}, {transform_indices = @transform_2, window_bounds = array<i64: 1, 2048>}, {transform_indices = @transform_3, window_bounds = array<i64: 1, 2048>}]} {
    %c0 = arith.constant 0 : index
    %c0_0 = arith.constant 0 : index
    %0 = vector.load %arg1[%c0, %c0_0] : memref<1x2048xf32, #tpu.memory_space<vmem>>, vector<1x2048xf32>
    %cst = arith.constant 0.000000e+00 : f32
    %1 = vector.broadcast %cst : f32 to vector<1x2048xf32>
    %2 = arith.maximumf %0, %1 : vector<1x2048xf32>
    %c0_1 = arith.constant 0 : index
    %c0_2 = arith.constant 0 : index
    %3 = vector.load %arg3[%c0_1, %c0_2] : memref<1x2048xf32, #tpu.memory_space<vmem>>, vector<1x2048xf32>
    tpu.vector_store %arg3[%c0_1, %c0_2], %2 {strides = array<i32>} : memref<1x2048xf32, #tpu.memory_space<vmem>>, vector<1x2048xf32>,
    %c0_3 = arith.constant 0 : index
    %c0_4 = arith.constant 0 : index
    %4 = vector.load %arg2[%c0_3, %c0_4] : memref<1x2048xf32, #tpu.memory_space<vmem>>, vector<1x2048xf32>
    %cst_5 = arith.constant 0.000000e+00 : f32
    %5 = vector.broadcast %cst_5 : f32 to vector<1x2048xf32>
    %6 = arith.maximumf %4, %5 : vector<1x2048xf32>
    %c0_6 = arith.constant 0 : index
    %c0_7 = arith.constant 0 : index
    %7 = vector.load %arg4[%c0_6, %c0_7] : memref<1x2048xf32, #tpu.memory_space<vmem>>, vector<1x2048xf32>
    tpu.vector_store %arg4[%c0_6, %c0_7], %6 {strides = array<i32>} : memref<1x2048xf32, #tpu.memory_space<vmem>>, vector<1x2048xf32>,
    return
  }
  func.func @transform_0(%arg0: i32) -> (i32, i32) {
    %c0_i32 = arith.constant 0 : i32
    %c0_i32_0 = arith.constant 0 : i32
    return %arg0, %c0_i32 : i32, i32
  }
  func.func @transform_1(%arg0: i32) -> (i32, i32) {
    %c0_i32 = arith.constant 0 : i32
    %c0_i32_0 = arith.constant 0 : i32
    return %arg0, %c0_i32 : i32, i32
  }
  func.func @transform_2(%arg0: i32) -> (i32, i32) {
    %c0_i32 = arith.constant 0 : i32
    %c0_i32_0 = arith.constant 0 : i32
    return %arg0, %c0_i32 : i32, i32
  }
  func.func @transform_3(%arg0: i32) -> (i32, i32) {
    %c0_i32 = arith.constant 0 : i32
    %c0_i32_0 = arith.constant 0 : i32
    return %arg0, %c0_i32 : i32, i32
  }
}

</mosaic_0001>

<bundles_post_ra>
// kernel: tpu_custom_call.1
= control target key start
LH: loop header
LB: loop body
LE: loop exit
PB: predicated region body
PF: predicated region fallthrough
CT: control target
= control target key end

     0   :  { %9 = vsyncpa [#allocation3], 0  ;;  %s233_s0 = inlined_call_operand.hbm [shape: f32[1,2048], index: 0, kind: input, shape index: {}]   ;;  %s234_s1 = inlined_call_operand.hbm [shape: f32[1,2048], index: 1, kind: input, shape index: {}]   ;;  %s235_s2 = inlined_call_operand.hbm [shape: f32[1,2048], index: 2, kind: output, shape index: {0}]   ;;  %s236_s3 = inlined_call_operand.hbm [shape: f32[1,2048], index: 3, kind: output, shape index: {1}]  }
   0x1   :  { %10 = vsyncpa [#allocation6], 0 }
   0x2   :  { %11 = vsyncpa [#allocation4], 0 }
   0x3   :  { %12 = vsyncpa [#allocation9], 0  ;;  %s18_s14 = sshll.u32 %s233_s0, 4  ;;  %s197_s15 = smov [#allocation2]   ;;  %s19_s14 = int_to_ptr.hbm [resolvable:$true] %s18_s14 }
   0x4   :  { %s20_s16 = sshll.u32 %s197_s15, 4  ;;  %s29_s19 = sshll.u32 %s234_s1, 4  ;;  %s21_s16 = int_to_ptr.vmem [resolvable:$true] %s20_s16  ;;  %s30_s19 = int_to_ptr.hbm [resolvable:$true] %s29_s19 }
   0x5   :  { %23 = dma.hbm_to_vmem [thread:$0]  %s19_s14, 256, %s21_s16, [#allocation3]  }
   0x6   :  { %s198_s20 = smov [#allocation5]  }
   0x7   :  { %s31_s21 = sshll.u32 %s198_s20, 4  ;;  %s32_s21 = int_to_ptr.vmem [resolvable:$true] %s31_s21 }
   0x8   :  { %34 = dma.hbm_to_vmem [thread:$0]  %s30_s19, 256, %s32_s21, [#allocation6]  }
   0x9   :  { %189 = dma.done.wait [#allocation3], 256  }
   0xa   :  { %190 = vsyncadd [#allocation3], 4294967040 }
   0xb   :  { %191 = dma.done.wait [#allocation6], 256  }
   0xc   :  { %192 = vsyncadd [#allocation6], 4294967040  ;;  %s199_s22 = smov [#allocation7]   ;;  %s62_s25 = sshll.u32 %s235_s2, 4  ;;  %v43_v0 = vld [vmem:[#allocation2] sm:$0xff]  ;;  %v44_v1 = vld [vmem:[#allocation2 + $0x8] sm:$0xff]  ;;  %s63_s25 = int_to_ptr.hbm [resolvable:$true] %s62_s25 }
   0xd   :  { %s60_s0 = sshll.u32 %s199_s22, 4  ;;  %v49_v2 = vld [vmem:[#allocation5] sm:$0xff]  ;;  %v45_v3 = vmax.f32 %v43_v0, 0.0  ;;  %v46_v4 = vmax.f32 %v44_v1, 0.0  ;;  %v50_v6 = vld [vmem:[#allocation5 + $0x8] sm:$0xff]  ;;  %s200_s1 = smov [#allocation8]   ;;  %s61_s0 = int_to_ptr.vmem [resolvable:$true] %s60_s0 }
   0xe   :  { %v51_v5 = vmax.f32 %v49_v2, 0.0  ;;  %s71_s26 = sshll.u32 %s200_s1, 4  ;;  %s73_s29 = sshll.u32 %s236_s3, 4  ;;  %v52_v7 = vmax.f32 %v50_v6, 0.0  ;;  %s72_s26 = int_to_ptr.vmem [resolvable:$true] %s71_s26  ;;  %s74_s29 = int_to_ptr.hbm [resolvable:$true] %s73_s29 }
   0xf   :  { %47 = vst [vmem:[#allocation7] sm:$0xff] %v45_v3 }
  0x10   :  { %48 = vst [vmem:[#allocation7 + $0x8] sm:$0xff] %v46_v4 }
  0x11   :  { %53 = vst [vmem:[#allocation8] sm:$0xff] %v51_v5  ;;  %65 = dma.vmem_to_hbm [thread:$0]  %s61_s0, 256, %s63_s25, [#allocation4]  }
  0x12   :  { %54 = vst [vmem:[#allocation8 + $0x8] sm:$0xff] %v52_v7 }
  0x13   :  { %76 = dma.vmem_to_hbm [thread:$0]  %s72_s26, 256, %s74_s29, [#allocation9]  }
  0x14   :  { %193 = dma.done.wait [#allocation4], 256  }
  0x15   :  { %194 = vsyncadd [#allocation4], 4294967040 }
  0x16   :  { %195 = dma.done.wait [#allocation9], 256  }
  0x17   :  { %196 = vsyncadd [#allocation9], 4294967040 }
  0x18   :  { %85 = vsyncpa [#allocation3], 1 }
  0x19   :  { %86 = vsyncpa [#allocation6], 1 }
  0x1a   :  { %87 = vsyncpa [#allocation4], 1 }
  0x1b   :  { %88 = vsyncpa [#allocation9], 1 }

</bundles_post_ra>
